<compile_context>
chip_gen: v6e
topology: v6e:2x2x1
jax: 0.10.0
libtpu: 0.0.40
codegen_flags: <defaults>
</compile_context>

<pallas_src>
import jax
import jax.numpy as jnp
from jax.experimental import pallas as pl
from jax.experimental.pallas import tpu as pltpu


def _round_up(x, m):
    return ((x + m - 1) // m) * m


def modelfc_kernel(x_ref, w0_ref, b0_ref, w1_ref, b1_ref, wh_ref, bh_ref, out_ref):
    """lin0 -> SiLU -> lin1 -> SiLU -> fused (actor | critic) head, all in VMEM."""
    cdt = w0_ref.dtype                       # compute dtype (f32 or bf16)
    x = x_ref[...].astype(cdt)

    # lin0 + SiLU (f32 MXU accumulation, f32 bias add)
    z = jnp.dot(x, w0_ref[...], preferred_element_type=jnp.float32) + b0_ref[...]
    z = z * jax.nn.sigmoid(z)                # EUP path; free relative to MXU

    # lin1 + SiLU
    z = jnp.dot(z.astype(cdt), w1_ref[...],
                preferred_element_type=jnp.float32) + b1_ref[...]
    z = z * jax.nn.sigmoid(z)

    # fused actor+critic head -> one lane-dense (TB, head_w) slab
    out_ref[...] = (
        jnp.dot(z.astype(cdt), wh_ref[...], preferred_element_type=jnp.float32)
        + bh_ref[...]
    )


def modelfc_forward(state, params, *, tb=256, compute_dtype=jnp.float32):
    """state: (B, n_inputs) f32. params: dict of pre-transposed weights/biases.

    Returns (logits (B, n_actions), value (B, 1)), both f32.
    """
    B, n_inputs = state.shape
    n_hidden = params["w0"].shape[1]
    n_actions = params["wa"].shape[1]

    # ---- fuse actor + critic heads into one lane-dense weight / bias ----
    head_w = _round_up(n_actions + 1, 128)
    wh = jnp.zeros((n_hidden, head_w), jnp.float32)
    wh = wh.at[:, :n_actions].set(params["wa"])
    wh = wh.at[:, n_actions:n_actions + 1].set(params["wc"])
    bh = jnp.zeros((1, head_w), jnp.float32)
    bh = bh.at[:, :n_actions].set(params["ba"])
    bh = bh.at[:, n_actions:n_actions + 1].set(params["bc"])

    cdt = jnp.dtype(compute_dtype)
    w0 = params["w0"].astype(cdt)
    w1 = params["w1"].astype(cdt)
    wh = wh.astype(cdt)
    b0, b1 = params["b0"], params["b1"]      # biases stay f32

    # ---- pad batch to a multiple of the batch tile (>= one sublane tile of 8) ----
    tb_eff = _round_up(min(tb, _round_up(B, 8)), 8)
    Bp = _round_up(B, tb_eff)
    state_p = state if Bp == B else jnp.pad(state, ((0, Bp - B), (0, 0)))
    grid = (Bp // tb_eff,)

    flops = 2 * Bp * (n_inputs * n_hidden + n_hidden * n_hidden + n_hidden * head_w)
    bytes_accessed = (
        state_p.size * state_p.dtype.itemsize
        + w0.size * w0.dtype.itemsize
        + w1.size * w1.dtype.itemsize
        + wh.size * wh.dtype.itemsize
        + (b0.size + b1.size + bh.size) * 4
        + Bp * head_w * 4
    )
    cost = pl.CostEstimate(
        flops=flops,
        transcendentals=2 * Bp * n_hidden,   # two SiLU layers
        bytes_accessed=bytes_accessed,
    )

    out = pl.pallas_call(
        modelfc_kernel,
        out_shape=jax.ShapeDtypeStruct((Bp, head_w), jnp.float32),
        grid_spec=pltpu.PrefetchScalarGridSpec(
            num_scalar_prefetch=0,
            grid=grid,
            in_specs=[
                pl.BlockSpec((tb_eff, n_inputs), lambda i: (i, 0)),   # state tile
                pl.BlockSpec((n_inputs, n_hidden), lambda i: (0, 0)),  # w0 (resident)
                pl.BlockSpec((1, n_hidden), lambda i: (0, 0)),         # b0
                pl.BlockSpec((n_hidden, n_hidden), lambda i: (0, 0)),  # w1
                pl.BlockSpec((1, n_hidden), lambda i: (0, 0)),         # b1
                pl.BlockSpec((n_hidden, head_w), lambda i: (0, 0)),    # fused head W
                pl.BlockSpec((1, head_w), lambda i: (0, 0)),           # fused head b
            ],
            out_specs=pl.BlockSpec((tb_eff, head_w), lambda i: (i, 0)),
        ),
        compiler_params=pltpu.CompilerParams(
            dimension_semantics=("parallel",)),
        cost_estimate=cost,
    )(state_p, w0, b0, w1, b1, wh, bh)

    logits = out[:B, :n_actions]
    value = out[:B, n_actions:n_actions + 1]
    return logits, value


def orthogonal(key, out_dim, in_dim, gain):
    """Deterministic orthogonal init (same semantics as torch.nn.init.orthogonal_)."""
    rows, cols = out_dim, in_dim
    flat = jax.random.normal(key, (max(rows, cols), min(rows, cols)), dtype=jnp.float32)
    q, r = jnp.linalg.qr(flat)
    q = q * jnp.sign(jnp.diagonal(r))[None, :]
    if rows < cols:
        q = q.T
    return gain * q[:rows, :cols]


def init_params(n_inputs, n_actions, n_hidden=128, seed=0):
    keys = jax.random.split(jax.random.PRNGKey(seed), 4)
    # torch Linear weight is (out, in); store transposed (in, out) for the kernel.
    w0 = orthogonal(keys[0], n_hidden, n_inputs, 0.5).T
    w1 = orthogonal(keys[1], n_hidden, n_hidden, 0.5).T
    wa = orthogonal(keys[2], n_actions, n_hidden, 0.01).T
    wc = orthogonal(keys[3], 1, n_hidden, 0.1).T
    return {
        "w0": w0, "b0": jnp.zeros((1, n_hidden), jnp.float32),
        "w1": w1, "b1": jnp.zeros((1, n_hidden), jnp.float32),
        "wa": wa, "ba": jnp.zeros((1, n_actions), jnp.float32),
        "wc": wc, "bc": jnp.zeros((1, 1), jnp.float32),
    }


def reference_forward(state, params):
    z = state @ params["w0"] + params["b0"]
    z = z * jax.nn.sigmoid(z)
    z = z @ params["w1"] + params["b1"]
    z = z * jax.nn.sigmoid(z)
    logits = z @ params["wa"] + params["ba"]
    value = z @ params["wc"] + params["bc"]
    return logits, value


if __name__ == "__main__":
    n_inputs, n_actions, n_hidden = 16, 8, 128
    params = init_params(n_inputs, n_actions, n_hidden, seed=0)

    # --- small inference-style batch (B=2, padded to 8 sublanes internally) ---
    B = 2
    state = jax.random.normal(jax.random.PRNGKey(0), (B, n_inputs), dtype=jnp.float32)

    logits, value = modelfc_forward(state, params)
    jax.block_until_ready((logits, value))
    ref_logits, ref_value = reference_forward(state, params)
    assert logits.shape == (B, n_actions)
    assert value.shape == (B, 1)
    assert jnp.allclose(logits, ref_logits, atol=1e-5, rtol=1e-5)
    assert jnp.allclose(value, ref_value, atol=1e-5, rtol=1e-5)

    # --- larger, non-multiple-of-tile batch exercises the gridded path ---
    B2 = 300
    state2 = jax.random.normal(jax.random.PRNGKey(1), (B2, n_inputs), dtype=jnp.float32)
    logits2, value2 = modelfc_forward(state2, params, tb=256)
    jax.block_until_ready((logits2, value2))
    ref_logits2, ref_value2 = reference_forward(state2, params)
    assert jnp.allclose(logits2, ref_logits2, atol=1e-5, rtol=1e-5)
    assert jnp.allclose(value2, ref_value2, atol=1e-5, rtol=1e-5)

    # --- bf16 compute path (v6e/v7x MXU-native); loose tolerance sanity check ---
    logits_bf, value_bf = modelfc_forward(state2, params, tb=256,
                                          compute_dtype=jnp.bfloat16)
    jax.block_until_ready((logits_bf, value_bf))
    assert jnp.allclose(logits_bf, ref_logits2, atol=5e-2, rtol=5e-2)
    assert jnp.allclose(value_bf, ref_value2, atol=5e-2, rtol=5e-2)

    print("KERNEL_OK")
</pallas_src>

<mosaic_0001>
module attributes {stable_mosaic.version = 11 : i64} {
  func.func @modelfc_kernel(%arg0: i32, %arg1: memref<8x16xf32, #tpu.memory_space<vmem>>, %arg2: memref<16x128xf32, #tpu.memory_space<vmem>>, %arg3: memref<1x128xf32, #tpu.memory_space<vmem>>, %arg4: memref<128x128xf32, #tpu.memory_space<vmem>>, %arg5: memref<1x128xf32, #tpu.memory_space<vmem>>, %arg6: memref<128x128xf32, #tpu.memory_space<vmem>>, %arg7: memref<1x128xf32, #tpu.memory_space<vmem>>, %arg8: memref<8x128xf32, #tpu.memory_space<vmem>>) attributes {dimension_semantics = [#tpu.dimension_semantics<parallel>], iteration_bounds = array<i64: 1>, scalar_prefetch = 0 : i64, scratch_operands = 0 : i64, tpu.core_type = #tpu.core_type<tc>, window_params = [{transform_indices = @transform_0, window_bounds = array<i64: 8, 16>}, {pipeline_mode = #tpu.pipeline_mode<synchronous>, transform_indices = @transform_1, window_bounds = array<i64: 16, 128>}, {pipeline_mode = #tpu.pipeline_mode<synchronous>, transform_indices = @transform_2, window_bounds = array<i64: 1, 128>}, {pipeline_mode = #tpu.pipeline_mode<synchronous>, transform_indices = @transform_3, window_bounds = array<i64: 128, 128>}, {pipeline_mode = #tpu.pipeline_mode<synchronous>, transform_indices = @transform_4, window_bounds = array<i64: 1, 128>}, {pipeline_mode = #tpu.pipeline_mode<synchronous>, transform_indices = @transform_5, window_bounds = array<i64: 128, 128>}, {pipeline_mode = #tpu.pipeline_mode<synchronous>, transform_indices = @transform_6, window_bounds = array<i64: 1, 128>}, {transform_indices = @transform_7, window_bounds = array<i64: 8, 128>}]} {
    %c0 = arith.constant 0 : index
    %c0_0 = arith.constant 0 : index
    %0 = vector.load %arg1[%c0, %c0_0] : memref<8x16xf32, #tpu.memory_space<vmem>>, vector<8x16xf32>
    %c0_1 = arith.constant 0 : index
    %c0_2 = arith.constant 0 : index
    %1 = vector.load %arg2[%c0_1, %c0_2] : memref<16x128xf32, #tpu.memory_space<vmem>>, vector<16x128xf32>
    %cst = arith.constant dense<0.000000e+00> : vector<8x128xf32>
    %2 = tpu.matmul %0, %1, %cst {dimension_numbers = #tpu.dot_dimension_numbers<[1], [0], [0], [1], [0, 0, 1, 1], [], []>} : vector<8x16xf32>, vector<16x128xf32>, vector<8x128xf32> -> vector<8x128xf32>
    %c0_3 = arith.constant 0 : index
    %c0_4 = arith.constant 0 : index
    %3 = vector.load %arg3[%c0_3, %c0_4] : memref<1x128xf32, #tpu.memory_space<vmem>>, vector<1x128xf32>
    %4 = vector.broadcast %3 : vector<1x128xf32> to vector<8x128xf32>
    %5 = arith.addf %2, %4 : vector<8x128xf32>
    %6 = arith.negf %5 : vector<8x128xf32>
    %7 = math.exp %6 : vector<8x128xf32>
    %cst_5 = arith.constant 1.000000e+00 : f32
    %8 = vector.broadcast %cst_5 : f32 to vector<8x128xf32>
    %9 = arith.addf %8, %7 : vector<8x128xf32>
    %10 = arith.divf %8, %9 : vector<8x128xf32>
    %11 = arith.mulf %5, %10 : vector<8x128xf32>
    %c0_6 = arith.constant 0 : index
    %c0_7 = arith.constant 0 : index
    %12 = vector.load %arg4[%c0_6, %c0_7] : memref<128x128xf32, #tpu.memory_space<vmem>>, vector<128x128xf32>
    %cst_8 = arith.constant dense<0.000000e+00> : vector<8x128xf32>
    %13 = tpu.matmul %11, %12, %cst_8 {dimension_numbers = #tpu.dot_dimension_numbers<[1], [0], [0], [1], [0, 0, 1, 1], [], []>} : vector<8x128xf32>, vector<128x128xf32>, vector<8x128xf32> -> vector<8x128xf32>
    %c0_9 = arith.constant 0 : index
    %c0_10 = arith.constant 0 : index
    %14 = vector.load %arg5[%c0_9, %c0_10] : memref<1x128xf32, #tpu.memory_space<vmem>>, vector<1x128xf32>
    %15 = vector.broadcast %14 : vector<1x128xf32> to vector<8x128xf32>
    %16 = arith.addf %13, %15 : vector<8x128xf32>
    %17 = arith.negf %16 : vector<8x128xf32>
    %18 = math.exp %17 : vector<8x128xf32>
    %cst_11 = arith.constant 1.000000e+00 : f32
    %19 = vector.broadcast %cst_11 : f32 to vector<8x128xf32>
    %20 = arith.addf %19, %18 : vector<8x128xf32>
    %21 = arith.divf %19, %20 : vector<8x128xf32>
    %22 = arith.mulf %16, %21 : vector<8x128xf32>
    %c0_12 = arith.constant 0 : index
    %c0_13 = arith.constant 0 : index
    %23 = vector.load %arg6[%c0_12, %c0_13] : memref<128x128xf32, #tpu.memory_space<vmem>>, vector<128x128xf32>
    %cst_14 = arith.constant dense<0.000000e+00> : vector<8x128xf32>
    %24 = tpu.matmul %22, %23, %cst_14 {dimension_numbers = #tpu.dot_dimension_numbers<[1], [0], [0], [1], [0, 0, 1, 1], [], []>} : vector<8x128xf32>, vector<128x128xf32>, vector<8x128xf32> -> vector<8x128xf32>
    %c0_15 = arith.constant 0 : index
    %c0_16 = arith.constant 0 : index
    %25 = vector.load %arg7[%c0_15, %c0_16] : memref<1x128xf32, #tpu.memory_space<vmem>>, vector<1x128xf32>
    %26 = vector.broadcast %25 : vector<1x128xf32> to vector<8x128xf32>
    %27 = arith.addf %24, %26 : vector<8x128xf32>
    %c0_17 = arith.constant 0 : index
    %c0_18 = arith.constant 0 : index
    %28 = vector.load %arg8[%c0_17, %c0_18] : memref<8x128xf32, #tpu.memory_space<vmem>>, vector<8x128xf32>
    tpu.vector_store %arg8[%c0_17, %c0_18], %27 {strides = array<i32>} : memref<8x128xf32, #tpu.memory_space<vmem>>, vector<8x128xf32>,
    return
  }
  func.func @transform_0(%arg0: i32) -> (i32, i32) {
    %c0_i32 = arith.constant 0 : i32
    %c0_i32_0 = arith.constant 0 : i32
    return %arg0, %c0_i32 : i32, i32
  }
  func.func @transform_1(%arg0: i32) -> (i32, i32) {
    %c0_i32 = arith.constant 0 : i32
    %c0_i32_0 = arith.constant 0 : i32
    %c0_i32_1 = arith.constant 0 : i32
    return %c0_i32, %c0_i32_0 : i32, i32
  }
  func.func @transform_2(%arg0: i32) -> (i32, i32) {
    %c0_i32 = arith.constant 0 : i32
    %c0_i32_0 = arith.constant 0 : i32
    %c0_i32_1 = arith.constant 0 : i32
    return %c0_i32, %c0_i32_0 : i32, i32
  }
  func.func @transform_3(%arg0: i32) -> (i32, i32) {
    %c0_i32 = arith.constant 0 : i32
    %c0_i32_0 = arith.constant 0 : i32
    %c0_i32_1 = arith.constant 0 : i32
    return %c0_i32, %c0_i32_0 : i32, i32
  }
  func.func @transform_4(%arg0: i32) -> (i32, i32) {
    %c0_i32 = arith.constant 0 : i32
    %c0_i32_0 = arith.constant 0 : i32
    %c0_i32_1 = arith.constant 0 : i32
    return %c0_i32, %c0_i32_0 : i32, i32
  }
  func.func @transform_5(%arg0: i32) -> (i32, i32) {
    %c0_i32 = arith.constant 0 : i32
    %c0_i32_0 = arith.constant 0 : i32
    %c0_i32_1 = arith.constant 0 : i32
    return %c0_i32, %c0_i32_0 : i32, i32
  }
  func.func @transform_6(%arg0: i32) -> (i32, i32) {
    %c0_i32 = arith.constant 0 : i32
    %c0_i32_0 = arith.constant 0 : i32
    %c0_i32_1 = arith.constant 0 : i32
    return %c0_i32, %c0_i32_0 : i32, i32
  }
  func.func @transform_7(%arg0: i32) -> (i32, i32) {
    %c0_i32 = arith.constant 0 : i32
    %c0_i32_0 = arith.constant 0 : i32
    return %arg0, %c0_i32 : i32, i32
  }
}

</mosaic_0001>

<bundles_post_ra>
// kernel: tpu_custom_call.1
= control target key start
LH: loop header
LB: loop body
LE: loop exit
PB: predicated region body
PF: predicated region fallthrough
CT: control target
= control target key end

     0   :  { %12 = vsyncpa [#allocation3], 0  ;;  %s746_s0 = inlined_call_operand.hbm [shape: f32[8,16], index: 0, kind: input, shape index: {}]   ;;  %s747_s1 = inlined_call_operand.hbm [shape: f32[16,128], index: 1, kind: input, shape index: {}]   ;;  %s748_s2 = inlined_call_operand.vmem [shape: f32[1,128], index: 2, kind: input, shape index: {}]   ;;  %s749_s3 = inlined_call_operand.hbm [shape: f32[128,128], index: 3, kind: input, shape index: {}]   ;;  %s750_s4 = inlined_call_operand.vmem [shape: f32[1,128], index: 4, kind: input, shape index: {}]   ;;  %s751_s5 = inlined_call_operand.hbm [shape: f32[128,128], index: 5, kind: input, shape index: {}]   ;;  %s752_s6 = inlined_call_operand.vmem [shape: f32[1,128], index: 6, kind: input, shape index: {}]   ;;  %s753_s7 = inlined_call_operand.hbm [shape: f32[8,128], index: 7, kind: output, shape index: {}]  }
   0x1   :  { %13 = vsyncpa [#allocation6], 0 }
   0x2   :  { %14 = vsyncpa [#allocation9], 0 }
   0x3   :  { %15 = vsyncpa [#allocation4], 0  ;;  %s627_s24 = smov [#allocation5]  }
   0x4   :  { %s31_s25 = sshll.u32 %s627_s24, 4  ;;  %s32_s25 = int_to_ptr.vmem [resolvable:$true] %s31_s25 }
   0x5   :  { %s527_s26 = scalar_lea.vmem %s32_s25, 256  ;;  %p532_p1 = scmp.lt.s32.totalorder %s32_s25, %s32_s25 }
   0x6   :  { %p528_p0 = scmp.ne.s32.totalorder %s32_s25, %s527_s26  ;;  %p533_p2 = scmp.lt.s32.totalorder %s527_s26, %s527_s26 }
   0x8   :  { %p534_p3 = por %p533_p2, %p532_p1 }
   0xa   :  { %p535_p4 = pnand %p534_p3, %p528_p0 }
   0xc   :  { %538 = shalt.err (!%p535_p4)
}
   0xd   :  { %s628_s27 = smov 128   ;;  %s629_s28 = smov 8  }
   0xe   :  { %37 = dma.hbm_to_vmem [thread:$0]  %s747_s1, 256, %s32_s25, [#allocation6], %s628_s27, %s628_s27, %s629_s28  }
   0xf   :  { %s630_s8 = smov [#allocation2]   ;;  %s631_s10 = smov [#allocation7]  }
  0x10   :  { %s22_s9 = sshll.u32 %s630_s8, 4  ;;  %s45_s11 = sshll.u32 %s631_s10, 4  ;;  %s23_s9 = int_to_ptr.vmem [resolvable:$true] %s22_s9  ;;  %s46_s11 = int_to_ptr.vmem [resolvable:$true] %s45_s11 }
  0x11   :  { %s547_s12 = scalar_lea.vmem %s23_s9, 128  ;;  %p552_p6 = scmp.lt.s32.totalorder %s23_s9, %s23_s9 }
  0x12   :  { %p548_p5 = scmp.ne.s32.totalorder %s23_s9, %s547_s12  ;;  %p553_p7 = scmp.lt.s32.totalorder %s547_s12, %s547_s12 }
  0x14   :  { %p554_p8 = por %p553_p7, %p552_p6 }
  0x16   :  { %p555_p9 = pnand %p554_p8, %p548_p5 }
  0x18   :  { %558 = shalt.err (!%p555_p9)
}
  0x19   :  { %25 = dma.hbm_to_vmem [thread:$0]  %s746_s0, 128, %s23_s9, [#allocation3]  }
  0x1a   :  { %s567_s15 = scalar_lea.vmem %s46_s11, 2048  ;;  %p572_p11 = scmp.lt.s32.totalorder %s46_s11, %s46_s11 }
  0x1b   :  { %p568_p10 = scmp.ne.s32.totalorder %s46_s11, %s567_s15  ;;  %p573_p12 = scmp.lt.s32.totalorder %s567_s15, %s567_s15 }
  0x1d   :  { %p574_p13 = por %p573_p12, %p572_p11 }
  0x1f   :  { %p575_p0 = pnand %p574_p13, %p568_p10 }
  0x21   :  { %578 = shalt.err (!%p575_p0)
}
  0x22   :  { %51 = dma.hbm_to_vmem [thread:$0]  %s749_s3, 2048, %s46_s11, [#allocation6], %s628_s27, %s628_s27, %s629_s28  }
  0x23   :  { %s632_s17 = smov [#allocation8]  }
  0x24   :  { %s59_s18 = sshll.u32 %s632_s17, 4  ;;  %s60_s18 = int_to_ptr.vmem [resolvable:$true] %s59_s18 }
  0x25   :  { %s587_s19 = scalar_lea.vmem %s60_s18, 2048  ;;  %p592_p2 = scmp.lt.s32.totalorder %s60_s18, %s60_s18 }
  0x26   :  { %p588_p1 = scmp.ne.s32.totalorder %s60_s18, %s587_s19  ;;  %p593_p3 = scmp.lt.s32.totalorder %s587_s19, %s587_s19 }
  0x28   :  { %p594_p4 = por %p593_p3, %p592_p2 }
  0x2a   :  { %p595_p5 = pnand %p594_p4, %p588_p1 }
  0x2c   :  { %598 = shalt.err (!%p595_p5)
}
  0x2d   :  { %65 = dma.hbm_to_vmem [thread:$0]  %s751_s5, 2048, %s60_s18, [#allocation9], %s628_s27, %s628_s27, %s629_s28  }
  0x2e   :  { %619 = dma.done.wait [#allocation3], 128  }
  0x2f   :  { %620 = vsyncadd [#allocation3], 4294967168 }
  0x30   :  { %621 = dma.done.wait [#allocation6], 2304  }
  0x31   :  { %622 = vsyncadd [#allocation6], 4294964992 }
  0x32   :  { %623 = dma.done.wait [#allocation9], 2048  }
  0x33   :  { %624 = vsyncadd [#allocation9], 4294965248  ;;  %v633_v0 = vmov 0.0   ;;  %vm634_vm0 = vmmov 0   ;;  %v82_v1 = vld [vmem:[#allocation5 + $0x8] sm:$0xff]  ;;  %v81_v2 = vld [vmem:[#allocation5] sm:$0xff] }
  0x34   :  { %425 = vmatprep.subr.mxu0 %v633_v0  ;;  %429 = vmatprep.mubr.msk.f32.mxu0 %vm634_vm0, %v633_v0  ;;  %v80_v3 = vld [vmem:[#allocation2] sm:$0xff]  ;;  %vm90_vm1 = vcmask 130048   ;;  %v186_v4 = vld [vmem:[#allocation7 + $0x78] sm:$0xff]  ;;  %v185_v5 = vld [vmem:[#allocation7 + $0x70] sm:$0xff]  ;;  %s635_s24 = smov [#allocation10]  }
  0x35   :  { %432 = vmatprep.subr.mxu1 %v633_v0  ;;  %464 = vmatprep.mubr.msk.f32.mxu1 %vm634_vm0, %v633_v0  ;;  %v184_v6 = vld [vmem:[#allocation7 + $0x68] sm:$0xff]  ;;  %v183_v7 = vld [vmem:[#allocation7 + $0x60] sm:$0xff]  ;;  %v182_v8 = vld [vmem:[#allocation7 + $0x58] sm:$0xff]  ;;  %s371_s25 = sshll.u32 %s635_s24, 4  ;;  %s372_s25 = int_to_ptr.vmem [resolvable:$true] %s371_s25 }
  0x36   :  { %426 = vmatpush3.msra.mxu0 %v82_v1  ;;  %433 = vmatpush3.msra.mxu1 %v186_v4  ;;  %v181_v9 = vld [vmem:[#allocation7 + $0x50] sm:$0xff]  ;;  %v180_v10 = vld [vmem:[#allocation7 + $0x48] sm:$0xff]  ;;  %v179_v11 = vld [vmem:[#allocation7 + $0x40] sm:$0xff]  ;;  %p604_p7 = scmp.lt.s32.totalorder %s372_s25, %s372_s25 }
  0x37   :  { %427 = vmatprep.subr.mxu0 %v633_v0  ;;  %434 = vmatprep.subr.mxu1 %v633_v0  ;;  %v178_v12 = vld [vmem:[#allocation7 + $0x38] sm:$0xff]  ;;  %v177_v13 = vld [vmem:[#allocation7 + $0x30] sm:$0xff]  ;;  %v176_v14 = vld [vmem:[#allocation7 + $0x28] sm:$0xff] }
  0x38   :  { %428 = vmatpush3.msra.mxu0 %v81_v2  ;;  %435 = vmatpush3.msra.mxu1 %v185_v5  ;;  %v175_v15 = vld [vmem:[#allocation7 + $0x20] sm:$0xff]  ;;  %v174_v16 = vld [vmem:[#allocation7 + $0x18] sm:$0xff]  ;;  %v173_v17 = vld [vmem:[#allocation7 + $0x10] sm:$0xff] }
  0x39   :  { %430 = vmatmul.mubr.msk.f32.vlgmr.msra.gmra.mxu0 %vm90_vm1, %v80_v3  ;;  %467 = vmatprep.subr.mxu0 %v633_v0  ;;  %v172_v18 = vld [vmem:[#allocation7 + $0x8] sm:$0xff]  ;;  %v171_v19 = vld [vmem:[#allocation7] sm:$0xff]  ;;  %v286_v29 = vld [vmem:[#allocation8 + $0x78] sm:$0xff] }
  0x3a   :  { %499 = vmatprep.mubr.msk.f32.mxu0 %vm634_vm0, %v633_v0  ;;  %436 = vmatprep.subr.mxu1 %v633_v0  ;;  %v382_v20 = vld [vmem:[%s748_s2] ss:$0 sm:$0xff]  ;;  %v285_v30 = vld [vmem:[#allocation8 + $0x70] sm:$0xff]  ;;  %v283_v32 = vld [vmem:[#allocation8 + $0x60] sm:$0xff] }
  0x3b   :  { %437 = vmatpush3.msra.mxu1 %v184_v6  ;;  %468 = vmatpush3.msra.mxu0 %v286_v29  ;;  %v284_v31 = vld [vmem:[#allocation8 + $0x68] sm:$0xff]  ;;  %v282_v33 = vld [vmem:[#allocation8 + $0x58] sm:$0xff]  ;;  %v281_v34 = vld [vmem:[#allocation8 + $0x50] sm:$0xff] }
  0x3c   :  { %438 = vmatprep.subr.mxu1 %v633_v0  ;;  %469 = vmatprep.subr.mxu0 %v633_v0  ;;  %v280_v35 = vld [vmem:[#allocation8 + $0x48] sm:$0xff]  ;;  %v279_v36 = vld [vmem:[#allocation8 + $0x40] sm:$0xff]  ;;  %v278_v37 = vld [vmem:[#allocation8 + $0x38] sm:$0xff] }
  0x3d   :  { %439 = vmatpush3.msra.mxu1 %v183_v7  ;;  %470 = vmatpush3.msra.mxu0 %v285_v30  ;;  %v277_v38 = vld [vmem:[#allocation8 + $0x30] sm:$0xff]  ;;  %v276_v39 = vld [vmem:[#allocation8 + $0x28] sm:$0xff]  ;;  %v275_v40 = vld [vmem:[#allocation8 + $0x20] sm:$0xff] }
  0x3e   :  { %440 = vmatprep.subr.mxu1 %v633_v0  ;;  %471 = vmatprep.subr.mxu0 %v633_v0  ;;  %v274_v41 = vld [vmem:[#allocation8 + $0x18] sm:$0xff]  ;;  %v273_v42 = vld [vmem:[#allocation8 + $0x10] sm:$0xff]  ;;  %v272_v43 = vld [vmem:[#allocation8 + $0x8] sm:$0xff] }
  0x3f   :  { %441 = vmatpush3.msra.mxu1 %v182_v8  ;;  %472 = vmatpush3.msra.mxu0 %v284_v31  ;;  %v271_v44 = vld [vmem:[#allocation8] sm:$0xff]  ;;  %v385_v45 = vld [vmem:[%s750_s4] ss:$0 sm:$0xff]  ;;  %s599_s4 = scalar_lea.vmem %s372_s25, 128 }
  0x40   :  { %442 = vmatprep.subr.mxu1 %v633_v0  ;;  %473 = vmatprep.subr.mxu0 %v633_v0  ;;  %v387_v54 = vld [vmem:[%s752_s6] ss:$0 sm:$0xff]  ;;  %p600_p6 = scmp.ne.s32.totalorder %s372_s25, %s599_s4  ;;  %p605_p8 = scmp.lt.s32.totalorder %s599_s4, %s599_s4 }
  0x41   :  { %443 = vmatpush3.msra.mxu1 %v181_v9  ;;  %474 = vmatpush3.msra.mxu0 %v283_v32 }
  0x42   :  { %444 = vmatprep.subr.mxu1 %v633_v0  ;;  %475 = vmatprep.subr.mxu0 %v633_v0  ;;  %p606_p9 = por %p605_p8, %p604_p7 }
  0x43   :  { %445 = vmatpush3.msra.mxu1 %v180_v10  ;;  %476 = vmatpush3.msra.mxu0 %v282_v33 }
  0x44   :  { %446 = vmatprep.subr.mxu1 %v633_v0  ;;  %477 = vmatprep.subr.mxu0 %v633_v0  ;;  %p607_p10 = pnand %p606_p9, %p600_p6 }
  0x45   :  { %447 = vmatpush3.msra.mxu1 %v179_v11  ;;  %478 = vmatpush3.msra.mxu0 %v281_v34 }
  0x46   :  { %448 = vmatprep.subr.mxu1 %v633_v0  ;;  %479 = vmatprep.subr.mxu0 %v633_v0 }
  0x47   :  { %449 = vmatpush3.msra.mxu1 %v178_v12  ;;  %480 = vmatpush3.msra.mxu0 %v280_v35 }
  0x48   :  { %450 = vmatprep.subr.mxu1 %v633_v0  ;;  %481 = vmatprep.subr.mxu0 %v633_v0 }
  0x49   :  { %451 = vmatpush3.msra.mxu1 %v177_v13  ;;  %482 = vmatpush3.msra.mxu0 %v279_v36 }
  0x4a   :  { %452 = vmatprep.subr.mxu1 %v633_v0  ;;  %483 = vmatprep.subr.mxu0 %v633_v0 }
  0x4b   :  { %453 = vmatpush3.msra.mxu1 %v176_v14  ;;  %484 = vmatpush3.msra.mxu0 %v278_v37 }
  0x4c   :  { %454 = vmatprep.subr.mxu1 %v633_v0  ;;  %485 = vmatprep.subr.mxu0 %v633_v0 }
  0x4d   :  { %455 = vmatpush3.msra.mxu1 %v175_v15  ;;  %486 = vmatpush3.msra.mxu0 %v277_v38 }
  0x4e   :  { %456 = vmatprep.subr.mxu1 %v633_v0  ;;  %487 = vmatprep.subr.mxu0 %v633_v0 }
  0x4f   :  { %457 = vmatpush3.msra.mxu1 %v174_v16  ;;  %488 = vmatpush3.msra.mxu0 %v276_v39 }
  0x50   :  { %458 = vmatprep.subr.mxu1 %v633_v0  ;;  %489 = vmatprep.subr.mxu0 %v633_v0 }
  0x51   :  { %459 = vmatpush3.msra.mxu1 %v173_v17  ;;  %490 = vmatpush3.msra.mxu0 %v275_v40 }
  0x52   :  { %460 = vmatprep.subr.mxu1 %v633_v0  ;;  %491 = vmatprep.subr.mxu0 %v633_v0 }
  0x53   :  { %461 = vmatpush3.msra.mxu1 %v172_v18  ;;  %492 = vmatpush3.msra.mxu0 %v274_v41 }
  0x54   :  { %462 = vmatprep.subr.mxu1 %v633_v0  ;;  %493 = vmatprep.subr.mxu0 %v633_v0 }
  0x55   :  { %463 = vmatpush3.msra.mxu1 %v171_v19  ;;  %494 = vmatpush3.msra.mxu0 %v273_v42 }
  0x56   :  { %495 = vmatprep.subr.mxu0 %v633_v0 }
  0x57   :  { %496 = vmatpush3.msra.mxu0 %v272_v43 }
  0x58   :  { %497 = vmatprep.subr.mxu0 %v633_v0 }
  0x59   :  { %498 = vmatpush3.msra.mxu0 %v271_v44 }
  0xf9   :  { %v160_v21 = vpop.f32.mrf.mxu0 }
  0xfa   :  { %v161_v22 = vadd.f32 %v382_v20, %v160_v21 }
  0xfb   :  { %v431_v23 = vpop.f32.mrf.mxu0 }
  0xfc   :  { %v384_v24 = vmul.f32 -1.442695, %v161_v22 }
  0xfe   :  { %511 = vpow2.f32 %v384_v24 }
 0x10b   :  { %v512_v25 = vpop.eup %511 }
 0x10c   :  { %v167_v26 = vadd.f32 1.0, %v512_v25 }
 0x10e   :  { %513 = vrcp.f32 %v167_v26 }
 0x11b   :  { %v514_v27 = vpop.eup %513 }
 0x11c   :  { %v170_v28 = vmul.f32 %v514_v27, %v161_v22 }
 0x11e   :  { %465 = vmatmul.mubr.f32.vlgmr.msra.gmra.mxu1 %v170_v28 }
 0x1de   :  { %v260_v46 = vpop.f32.mrf.mxu1 }
 0x1df   :  { %v261_v47 = vadd.f32 %v385_v45, %v260_v46 }
 0x1e0   :  { %v466_v48 = vpop.f32.mrf.mxu1 }
 0x1e1   :  { %v386_v49 = vmul.f32 -1.442695, %v261_v47 }
 0x1e3   :  { %515 = vpow2.f32 %v386_v49 }
 0x1f0   :  { %v516_v50 = vpop.eup %515 }
 0x1f1   :  { %v267_v51 = vadd.f32 1.0, %v516_v50 }
 0x1f3   :  { %517 = vrcp.f32 %v267_v51 }
 0x200   :  { %v518_v52 = vpop.eup %517 }
 0x201   :  { %v270_v53 = vmul.f32 %v518_v52, %v261_v47 }
 0x203   :  { %500 = vmatmul.mubr.f32.vlgmr.msra.gmra.mxu0 %v270_v53 }
 0x2c3   :  { %v360_v55 = vpop.f32.mrf.mxu0 }
 0x2c4   :  { %v361_v56 = vadd.f32 %v387_v54, %v360_v55 }
 0x2c5   :  { %v501_v57 = vpop.f32.mrf.mxu0 }
 0x2c6   :  { %364 = vst [vmem:[#allocation10] sm:$0xff] %v361_v56 }
 0x2c7   :  { %610 = shalt.err (!%p607_p10)
}
 0x2c8   :  { %374 = dma.vmem_to_hbm [thread:$0]  %s372_s25, 128, %s753_s7, [#allocation4]  }
 0x2c9   :  { %625 = dma.done.wait [#allocation4], 128  }
 0x2ca   :  { %626 = vsyncadd [#allocation4], 4294967168 }
 0x2cb   :  { %378 = vsyncpa [#allocation3], 1 }
 0x2cc   :  { %379 = vsyncpa [#allocation6], 1 }
 0x2cd   :  { %380 = vsyncpa [#allocation9], 1 }
 0x2ce   :  { %381 = vsyncpa [#allocation4], 1 }

</bundles_post_ra>
